<compile_context>
chip_gen: v5e
topology: v5e:2x2
jax: 0.10.0
libtpu: 0.0.40
codegen_flags: <defaults>
</compile_context>

<pallas_src>
import jax
import jax.numpy as jnp
from jax.experimental import pallas as pl
from jax.experimental.pallas import tpu as pltpu


# ----------------------------------------------------------------------------
# Small helpers
# ----------------------------------------------------------------------------
def _round_up(v, m):
    return ((v + m - 1) // m) * m


def _vmem_capacity_bytes():
    # Generation-aware physical VMEM (128 MiB on v5e/v6e, 64 MiB on v7x).
    try:
        return int(pltpu.get_tpu_info().vmem_capacity_bytes)
    except Exception:
        return 64 * 1024 * 1024  # conservative (v7x-sized) fallback


# ----------------------------------------------------------------------------
# Fused single-block kernel: one HBM pass over x (read once, write once).
# ----------------------------------------------------------------------------
def _fused_kernel(x_ref, w1t_ref, w2_ref, cw_ref, cb_ref, o_ref):
    # x_ref: (C, S)   w1t_ref: (C, Cr)   w2_ref: (C, Cr)   cw_ref: (1, C)
    # cb_ref: (1,) scalar in SMEM        o_ref: (C, S)
    x = x_ref[...]

    # ---- channel SE: global average pool + tiny MLP on the VPU ----
    pooled = jnp.mean(x.astype(jnp.float32), axis=1, keepdims=True)          # (C, 1)
    h = jnp.sum(w1t_ref[...] * pooled, axis=0, keepdims=True)                # (1, Cr) == w1 @ pooled
    h = jnp.maximum(h, 0.0)
    y = jax.nn.sigmoid(jnp.sum(w2_ref[...] * h, axis=1, keepdims=True))      # (C, 1) == sigmoid(w2 @ h)

    # ---- spatial SE: 1x1x1 conv (C -> 1) + bias, sigmoid (MXU dot, K=C) ----
    s = jnp.dot(cw_ref[...], x, preferred_element_type=jnp.float32) + cb_ref[0]   # (1, S)
    s = jax.nn.sigmoid(s)

    # ---- fused combine: cSE(x) + sSE(x) = x * (y + s) ----
    o_ref[...] = (x * (y + s)).astype(o_ref.dtype)


# ----------------------------------------------------------------------------
# Tiled path, pass 1: per-channel spatial sums (reduction over a grid axis).
# red_axis selects which grid axis is the reduction axis (1 for the plain
# layout, 2 for the B==1 two-way megacore split).
# ----------------------------------------------------------------------------
def _make_pool_sum_kernel(red_axis):
    def kernel(x_ref, sum_ref):
        # x_ref: (C, TS)   sum_ref: (C, 1) f32, resident across the reduction axis
        @pl.when(pl.program_id(red_axis) == 0)
        def _():
            sum_ref[...] = jnp.zeros_like(sum_ref)

        sum_ref[...] += jnp.sum(x_ref[...].astype(jnp.float32), axis=1, keepdims=True)

    return kernel


# ----------------------------------------------------------------------------
# Tiled path, pass 2: streaming apply of both gates on lane-dense S tiles.
# ----------------------------------------------------------------------------
def _apply_kernel(x_ref, y_ref, cw_ref, cb_ref, o_ref):
    # x_ref: (C, TS)   y_ref: (C, 1) precomputed channel gate
    # cw_ref: (1, C)   cb_ref: (1,) scalar in SMEM   o_ref: (C, TS)
    x = x_ref[...]
    s = jnp.dot(cw_ref[...], x, preferred_element_type=jnp.float32) + cb_ref[0]   # (1, TS)
    s = jax.nn.sigmoid(s)
    o_ref[...] = (x * (y_ref[...] + s)).astype(o_ref.dtype)


# ----------------------------------------------------------------------------
# Tile selection: lane-dense multiple of 128 near the byte cap; with wrapper
# padding there is no "TS must divide S" constraint.  After picking the lane
# cap we rebalance so all tiles are (nearly) equal and padding is minimal.
# ----------------------------------------------------------------------------
def _pick_spatial_tile(S, C, itemsize, max_tile_bytes):
    lanes_cap = max(128, (max_tile_bytes // (C * itemsize)) // 128 * 128)
    ts = min(lanes_cap, _round_up(S, 128))
    n_s = -(-S // ts)
    ts = _round_up(-(-S // n_s), 128)   # balanced tile, still a multiple of 128
    return ts


def channel_spatial_se_block(x_ncdhw, w1, w2, conv_w, conv_b, *,
                             force_tiled=False,
                             max_tile_bytes=None):
    """x_ncdhw: (B, C, D, H, W).
    w1: (C//r, C)   first Linear weight (no bias)
    w2: (C, C//r)   second Linear weight (no bias)
    conv_w: (1, C)  Conv3d(C->1, k=1) weight flattened
    conv_b: (1,)    Conv3d bias
    """
    B, C, D, H, W = x_ncdhw.shape
    S = D * H * W
    x = x_ncdhw.reshape(B, C, S)
    Cr = w1.shape[0]
    cw = conv_w.reshape(1, C).astype(x.dtype)
    cb = conv_b.reshape(1).astype(jnp.float32)
    itemsize = jnp.dtype(x.dtype).itemsize

    vmem_cap = _vmem_capacity_bytes()

    # ---- fused single-block path (generation-aware cap) --------------------
    # Footprint estimate: in + out double-buffered (4 slabs) plus up to ~2
    # slab-sized elementwise temporaries inside the kernel -> 6x slab.  Keep
    # the total under ~75% of physical VMEM (headroom for weights + Mosaic
    # internal scratch), and raise the scoped-VMEM limit so the default
    # 16/32 MiB limit does not gate it on v5e/v6e.
    fused_budget = (3 * vmem_cap) // 4
    fused_bytes = 6 * C * S * itemsize + 2 * C * (Cr + 1) * 4 + (1 << 20)
    # NOTE(v7x): with B == 1 the fused grid=(B,) leaves one TensorCore idle,
    # but the 2x-vs-3x HBM traffic saving still wins; kept unconditionally.
    if (not force_tiled) and fused_bytes <= fused_budget:
        out = pl.pallas_call(
            _fused_kernel,
            out_shape=jax.ShapeDtypeStruct((B, C, S), x.dtype),
            grid_spec=pltpu.PrefetchScalarGridSpec(
                num_scalar_prefetch=0,
                grid=(B,),
                in_specs=[
                    pl.BlockSpec((None, C, S), lambda b: (b, 0, 0)),   # x (batch squeezed)
                    pl.BlockSpec((C, Cr), lambda b: (0, 0)),           # w1^T
                    pl.BlockSpec((C, Cr), lambda b: (0, 0)),           # w2
                    pl.BlockSpec((1, C), lambda b: (0, 0)),            # conv weight
                    pl.BlockSpec(memory_space=pltpu.MemorySpace.SMEM), # conv bias scalar
                ],
                out_specs=pl.BlockSpec((None, C, S), lambda b: (b, 0, 0)),
            ),
            compiler_params=pltpu.CompilerParams(
                dimension_semantics=("parallel",),
                vmem_limit_bytes=int(0.85 * vmem_cap)),
        )(x, jnp.transpose(w1).astype(jnp.float32), w2.astype(jnp.float32), cw, cb)
        return out.reshape(B, C, D, H, W)

    # ---------------------------- tiled two-pass path ----------------------------
    if max_tile_bytes is None:
        # 128 MiB VMEM chips (v5e/v6e): ~6 MiB tiles; 64 MiB (v7x): ~4 MiB tiles.
        max_tile_bytes = (6 << 20) if vmem_cap >= (96 << 20) else (4 << 20)
    tiled_vmem_limit = min(48 << 20, (3 * vmem_cap) // 4)

    TS = _pick_spatial_tile(S, C, itemsize, max_tile_bytes)
    n_s = -(-S // TS)

    # Megacore (v7x, 2 TCs): with B == 1 a ("parallel","arbitrary") pooling grid
    # serializes on one core; split the reduction into 2 parallel partials.
    # Harmless on 1-TC chips (tiny extra output + one JAX sum).
    split = (B == 1) and (n_s >= 2)
    if split:
        n_half = -(-n_s // 2)
        n_s = 2 * n_half
    S_pad = n_s * TS
    if S_pad != S:
        # Zero padding is neutral for the pooled sums; the mean divides by the
        # true S and padded output columns (x == 0) are sliced off below.
        x = jnp.pad(x, ((0, 0), (0, 0), (0, S_pad - S)))

    # Pass 1: per-channel spatial sums.
    if split:
        sums = pl.pallas_call(
            _make_pool_sum_kernel(2),
            out_shape=jax.ShapeDtypeStruct((B, 2, C, 1), jnp.float32),
            grid_spec=pltpu.PrefetchScalarGridSpec(
                num_scalar_prefetch=0,
                grid=(B, 2, n_half),
                in_specs=[pl.BlockSpec((None, C, TS),
                                       lambda b, p, j: (b, 0, p * n_half + j))],
                out_specs=pl.BlockSpec((None, None, C, 1),
                                       lambda b, p, j: (b, p, 0, 0)),
            ),
            compiler_params=pltpu.CompilerParams(
                dimension_semantics=("parallel", "parallel", "arbitrary"),
                vmem_limit_bytes=tiled_vmem_limit),
        )(x)
        sums = jnp.sum(sums, axis=1)                              # (B, C, 1)
    else:
        sums = pl.pallas_call(
            _make_pool_sum_kernel(1),
            out_shape=jax.ShapeDtypeStruct((B, C, 1), jnp.float32),
            grid_spec=pltpu.PrefetchScalarGridSpec(
                num_scalar_prefetch=0,
                grid=(B, n_s),
                in_specs=[pl.BlockSpec((None, C, TS), lambda b, j: (b, 0, j))],
                out_specs=pl.BlockSpec((None, C, 1), lambda b, j: (b, 0, 0)),
            ),
            compiler_params=pltpu.CompilerParams(
                dimension_semantics=("parallel", "arbitrary"),
                vmem_limit_bytes=tiled_vmem_limit),
        )(x)

    # Tiny excitation MLP on (B, C): far too small for the MXU, plain JAX.
    pooled = sums[:, :, 0] / jnp.float32(S)                       # (B, C), true-S mean
    h = jnp.maximum(pooled @ jnp.transpose(w1).astype(jnp.float32), 0.0)   # (B, Cr)
    y = jax.nn.sigmoid(h @ jnp.transpose(w2).astype(jnp.float32))          # (B, C)
    y3 = y.reshape(B, C, 1).astype(jnp.float32)

    # Pass 2: streaming gate application, fully parallel grid (megacore-friendly).
    out = pl.pallas_call(
        _apply_kernel,
        out_shape=jax.ShapeDtypeStruct((B, C, S_pad), x.dtype),
        grid_spec=pltpu.PrefetchScalarGridSpec(
            num_scalar_prefetch=0,
            grid=(B, n_s),
            in_specs=[
                pl.BlockSpec((None, C, TS), lambda b, j: (b, 0, j)),   # x tile
                pl.BlockSpec((None, C, 1), lambda b, j: (b, 0, 0)),    # channel gate
                pl.BlockSpec((1, C), lambda b, j: (0, 0)),             # conv weight
                pl.BlockSpec(memory_space=pltpu.MemorySpace.SMEM),     # conv bias scalar
            ],
            out_specs=pl.BlockSpec((None, C, TS), lambda b, j: (b, 0, j)),
        ),
        compiler_params=pltpu.CompilerParams(
            dimension_semantics=("parallel", "parallel"),
            vmem_limit_bytes=tiled_vmem_limit),
    )(x, y3, cw, cb)

    if S_pad != S:
        out = out[:, :, :S]
    return out.reshape(B, C, D, H, W)


def _reference(x, w1, w2, conv_w, conv_b):
    # Plain-JAX reference matching the PyTorch forward.
    pooled = jnp.mean(x, axis=(2, 3, 4))                            # (B, C)
    h = jnp.maximum(pooled @ w1.T, 0.0)                             # (B, C//r)
    y = jax.nn.sigmoid(h @ w2.T)                                    # (B, C)
    cse = x * y[:, :, None, None, None]
    s = jnp.einsum('bcdhw,c->bdhw', x, conv_w[0]) + conv_b[0]       # (B, D, H, W)
    sse = x * jax.nn.sigmoid(s)[:, None]
    return cse + sse


if __name__ == "__main__":
    key = jax.random.PRNGKey(0)
    B, C, D, H, W = 2, 32, 4, 8, 8
    reduction = 16
    Cr = C // reduction

    k_x, k_w1, k_w2, k_cw, k_cb, k_x2, k_x3 = jax.random.split(key, 7)
    x = jax.random.normal(k_x, (B, C, D, H, W), dtype=jnp.float32)
    w1 = jax.random.normal(k_w1, (Cr, C), dtype=jnp.float32) * 0.2
    w2 = jax.random.normal(k_w2, (C, Cr), dtype=jnp.float32) * 0.2
    conv_w = jax.random.normal(k_cw, (1, C), dtype=jnp.float32) * 0.2
    conv_b = jax.random.normal(k_cb, (1,), dtype=jnp.float32) * 0.1

    # Path 1: fused single-block kernel (what small/medium feature maps use).
    ref = _reference(x, w1, w2, conv_w, conv_b)
    out_fused = jax.block_until_ready(
        channel_spatial_se_block(x, w1, w2, conv_w, conv_b))
    assert out_fused.shape == ref.shape
    assert jnp.max(jnp.abs(out_fused - ref)) < 1e-4, "fused path mismatch vs reference"

    # Path 2: S-tiled two-pass kernels.  Force 128-lane tiles so the spatial
    # grid axis and the pooled accumulation are exercised.
    out_tiled = jax.block_until_ready(
        channel_spatial_se_block(x, w1, w2, conv_w, conv_b,
                                 force_tiled=True,
                                 max_tile_bytes=128 * C * 4))
    assert out_tiled.shape == ref.shape
    assert jnp.max(jnp.abs(out_tiled - ref)) < 1e-4, "tiled path mismatch vs reference"

    # Path 3: S not a multiple of 128 -> exercises wrapper-side zero padding,
    # cross-tile accumulation and output slicing on the tiled path.
    x2 = jax.random.normal(k_x2, (B, C, 3, 5, 11), dtype=jnp.float32)
    ref2 = _reference(x2, w1, w2, conv_w, conv_b)
    out_pad = jax.block_until_ready(
        channel_spatial_se_block(x2, w1, w2, conv_w, conv_b,
                                 force_tiled=True,
                                 max_tile_bytes=128 * C * 4))
    assert out_pad.shape == ref2.shape
    assert jnp.max(jnp.abs(out_pad - ref2)) < 1e-4, "padded tiled path mismatch vs reference"

    # Path 4: B == 1 -> exercises the two-way megacore split of pass 1.
    x3 = jax.random.normal(k_x3, (1, C, 4, 8, 16), dtype=jnp.float32)
    ref3 = _reference(x3, w1, w2, conv_w, conv_b)
    out_split = jax.block_until_ready(
        channel_spatial_se_block(x3, w1, w2, conv_w, conv_b,
                                 force_tiled=True,
                                 max_tile_bytes=128 * C * 4))
    assert out_split.shape == ref3.shape
    assert jnp.max(jnp.abs(out_split - ref3)) < 1e-4, "split-reduction path mismatch vs reference"

    print("KERNEL_OK")
</pallas_src>

<mosaic_0001>
module attributes {stable_mosaic.version = 11 : i64} {
  func.func @_fused_kernel(%arg0: i32, %arg1: memref<1x32x256xf32, #tpu.memory_space<vmem>>, %arg2: memref<32x2xf32, #tpu.memory_space<vmem>>, %arg3: memref<32x2xf32, #tpu.memory_space<vmem>>, %arg4: memref<1x32xf32, #tpu.memory_space<vmem>>, %arg5: memref<1xf32, #tpu.memory_space<smem>>, %arg6: memref<1x32x256xf32, #tpu.memory_space<vmem>>) attributes {dimension_semantics = [#tpu.dimension_semantics<parallel>], iteration_bounds = array<i64: 2>, scalar_prefetch = 0 : i64, scratch_operands = 0 : i64, tpu.core_type = #tpu.core_type<tc>, window_params = [{transform_indices = @transform_0, window_bounds = array<i64: 1, 32, 256>}, {pipeline_mode = #tpu.pipeline_mode<synchronous>, transform_indices = @transform_1, window_bounds = array<i64: 32, 2>}, {pipeline_mode = #tpu.pipeline_mode<synchronous>, transform_indices = @transform_2, window_bounds = array<i64: 32, 2>}, {pipeline_mode = #tpu.pipeline_mode<synchronous>, transform_indices = @transform_3, window_bounds = array<i64: 1, 32>}, {transform_indices = @transform_4, window_bounds = array<i64: 1>}, {transform_indices = @transform_5, window_bounds = array<i64: 1, 32, 256>}]} {
    %c0 = arith.constant 0 : index
    %c0_0 = arith.constant 0 : index
    %c0_1 = arith.constant 0 : index
    %0 = vector.load %arg1[%c0, %c0_0, %c0_1] : memref<1x32x256xf32, #tpu.memory_space<vmem>>, vector<1x32x256xf32>
    %1 = vector.shape_cast %0 : vector<1x32x256xf32> to vector<32x256xf32>
    %cst = arith.constant dense<0.000000e+00> : vector<32xf32>
    %2 = vector.multi_reduction <add>, %1, %cst [1] : vector<32x256xf32> to vector<32xf32>
    %3 = vector.shape_cast %2 : vector<32xf32> to vector<32x1xf32>
    %cst_2 = arith.constant 2.560000e+02 : f32
    %4 = vector.broadcast %cst_2 : f32 to vector<32x1xf32>
    %5 = arith.divf %3, %4 : vector<32x1xf32>
    %c0_3 = arith.constant 0 : index
    %c0_4 = arith.constant 0 : index
    %6 = vector.load %arg2[%c0_3, %c0_4] : memref<32x2xf32, #tpu.memory_space<vmem>>, vector<32x2xf32>
    %7 = vector.broadcast %5 : vector<32x1xf32> to vector<32x2xf32>
    %8 = arith.mulf %6, %7 : vector<32x2xf32>
    %cst_5 = arith.constant dense<0.000000e+00> : vector<2xf32>
    %9 = vector.multi_reduction <add>, %8, %cst_5 [0] : vector<32x2xf32> to vector<2xf32>
    %10 = vector.shape_cast %9 : vector<2xf32> to vector<1x2xf32>
    %cst_6 = arith.constant 0.000000e+00 : f32
    %11 = vector.broadcast %cst_6 : f32 to vector<1x2xf32>
    %12 = arith.maximumf %10, %11 : vector<1x2xf32>
    %c0_7 = arith.constant 0 : index
    %c0_8 = arith.constant 0 : index
    %13 = vector.load %arg3[%c0_7, %c0_8] : memref<32x2xf32, #tpu.memory_space<vmem>>, vector<32x2xf32>
    %14 = vector.broadcast %12 : vector<1x2xf32> to vector<32x2xf32>
    %15 = arith.mulf %13, %14 : vector<32x2xf32>
    %cst_9 = arith.constant dense<0.000000e+00> : vector<32xf32>
    %16 = vector.multi_reduction <add>, %15, %cst_9 [1] : vector<32x2xf32> to vector<32xf32>
    %17 = vector.shape_cast %16 : vector<32xf32> to vector<32x1xf32>
    %18 = arith.negf %17 : vector<32x1xf32>
    %19 = math.exp %18 : vector<32x1xf32>
    %cst_10 = arith.constant 1.000000e+00 : f32
    %20 = vector.broadcast %cst_10 : f32 to vector<32x1xf32>
    %21 = arith.addf %20, %19 : vector<32x1xf32>
    %22 = arith.divf %20, %21 : vector<32x1xf32>
    %c0_11 = arith.constant 0 : index
    %c0_12 = arith.constant 0 : index
    %23 = vector.load %arg4[%c0_11, %c0_12] : memref<1x32xf32, #tpu.memory_space<vmem>>, vector<1x32xf32>
    %cst_13 = arith.constant dense<0.000000e+00> : vector<1x256xf32>
    %24 = tpu.matmul %23, %1, %cst_13 {dimension_numbers = #tpu.dot_dimension_numbers<[1], [0], [0], [1], [0, 0, 1, 1], [], []>} : vector<1x32xf32>, vector<32x256xf32>, vector<1x256xf32> -> vector<1x256xf32>
    %c0_14 = arith.constant 0 : index
    %25 = memref.load %arg5[%c0_14] : memref<1xf32, #tpu.memory_space<smem>>
    %26 = vector.broadcast %25 : f32 to vector<1x256xf32>
    %27 = arith.addf %24, %26 : vector<1x256xf32>
    %28 = arith.negf %27 : vector<1x256xf32>
    %29 = math.exp %28 : vector<1x256xf32>
    %cst_15 = arith.constant 1.000000e+00 : f32
    %30 = vector.broadcast %cst_15 : f32 to vector<1x256xf32>
    %31 = arith.addf %30, %29 : vector<1x256xf32>
    %32 = arith.divf %30, %31 : vector<1x256xf32>
    %33 = vector.broadcast %22 : vector<32x1xf32> to vector<32x256xf32>
    %34 = vector.broadcast %32 : vector<1x256xf32> to vector<32x256xf32>
    %35 = arith.addf %33, %34 : vector<32x256xf32>
    %36 = arith.mulf %1, %35 : vector<32x256xf32>
    %c0_16 = arith.constant 0 : index
    %c0_17 = arith.constant 0 : index
    %c0_18 = arith.constant 0 : index
    %37 = vector.load %arg6[%c0_16, %c0_17, %c0_18] : memref<1x32x256xf32, #tpu.memory_space<vmem>>, vector<1x32x256xf32>
    %38 = vector.shape_cast %37 : vector<1x32x256xf32> to vector<32x256xf32>
    %39 = vector.shape_cast %36 : vector<32x256xf32> to vector<1x32x256xf32>
    tpu.vector_store %arg6[%c0_16, %c0_17, %c0_18], %39 {strides = array<i32>} : memref<1x32x256xf32, #tpu.memory_space<vmem>>, vector<1x32x256xf32>,
    return
  }
  func.func @transform_0(%arg0: i32) -> (i32, i32, i32) {
    %c0_i32 = arith.constant 0 : i32
    %c0_i32_0 = arith.constant 0 : i32
    %c0_i32_1 = arith.constant 0 : i32
    return %arg0, %c0_i32, %c0_i32_0 : i32, i32, i32
  }
  func.func @transform_1(%arg0: i32) -> (i32, i32) {
    %c0_i32 = arith.constant 0 : i32
    %c0_i32_0 = arith.constant 0 : i32
    %c0_i32_1 = arith.constant 0 : i32
    return %c0_i32, %c0_i32_0 : i32, i32
  }
  func.func @transform_2(%arg0: i32) -> (i32, i32) {
    %c0_i32 = arith.constant 0 : i32
    %c0_i32_0 = arith.constant 0 : i32
    %c0_i32_1 = arith.constant 0 : i32
    return %c0_i32, %c0_i32_0 : i32, i32
  }
  func.func @transform_3(%arg0: i32) -> (i32, i32) {
    %c0_i32 = arith.constant 0 : i32
    %c0_i32_0 = arith.constant 0 : i32
    %c0_i32_1 = arith.constant 0 : i32
    return %c0_i32, %c0_i32_0 : i32, i32
  }
  func.func @transform_4(%arg0: i32) -> i32 {
    %c0_i32 = arith.constant 0 : i32
    %c0_i32_0 = arith.constant 0 : i32
    return %c0_i32 : i32
  }
  func.func @transform_5(%arg0: i32) -> (i32, i32, i32) {
    %c0_i32 = arith.constant 0 : i32
    %c0_i32_0 = arith.constant 0 : i32
    %c0_i32_1 = arith.constant 0 : i32
    return %arg0, %c0_i32, %c0_i32_0 : i32, i32, i32
  }
}

</mosaic_0001>

<bundles_post_ra>
// kernel: tpu_custom_call.1
= control target key start
LH: loop header
LB: loop body
LE: loop exit
PB: predicated region body
PF: predicated region fallthrough
CT: control target
= control target key end

     0   :  { %s1082_s0 = inlined_call_operand.hbm [shape: f32[2,32,256], index: 0, kind: input, shape index: {}]   ;;  %s1083_s1 = inlined_call_operand.vmem [shape: f32[32,2], index: 1, kind: input, shape index: {}]   ;;  %s1084_s2 = inlined_call_operand.vmem [shape: f32[32,2], index: 2, kind: input, shape index: {}]   ;;  %s1085_s3 = inlined_call_operand.vmem [shape: f32[1,32], index: 3, kind: input, shape index: {}]   ;;  %s1086_s4 = inlined_call_operand.<no memory space> [shape: f32[1], index: 4, kind: input, shape index: {}]   ;;  %s1087_s5 = inlined_call_operand.hbm [shape: f32[2,32,256], index: 5, kind: output, shape index: {}]  }
   0x1   :  { %10 = sst [smem:[#allocation2]] %s1086_s4 }
   0x2   :  { %11 = vsyncpa [#allocation4], 0 }
   0x3   :  { %13 = vsyncpa [#allocation4 + $0x1], 0 }
   0x4   :  { %14 = vsyncpa [#allocation5], 0 }
   0x5   :  { %16 = vsyncpa [#allocation5 + $0x1], 0  ;;  %s833_s20 = smov 0   ;;  %s835_s21 = smov 0  }
   0x6   :  { %s837_s22 = smov 0   ;;  %s839_s23 = smov 0  }
   0x7 LB: > { %s854_s4 = sadd.s32 4294967295, %s793_s23   ;;  %s596_s24 = sadd.s32 4294967294, %s793_s23   ;;  %s793_s23 = sphi %s839_s23, %s1099_s23   ;;  %s789_s22 = sphi %s837_s22, %s1098_s22   ;;  %s785_s21 = sphi %s835_s21, %s1097_s21   ;;  %s781_s20 = sphi %s833_s20, %s1096_s20  }
   0x8   : > { %s858_s25 = sadd.s32 1, %s793_s23   ;;  %s29_s26 = sadd.s32 1, %s789_s22 }
   0x9   : > { %s26_s27 = ssub.s32 %s793_s23, %s858_s25  ;;  %p36_p0 = scmp.ne.s32.totalorder %s789_s22, %s785_s21 }
   0xa   : > { %p27_p1 = scmp.eq.s32.totalorder %s26_s27, 0  ;;  %p37_p2 = scmp.eq.s32.totalorder %s793_s23, 0 }
   0xb   : > { %p42_p3 = scmp.ne.s32.totalorder %s785_s21, %s781_s20  ;;  %p43_p4 = scmp.eq.s32.totalorder %s854_s4, 0 }
   0xc   : > { %s870_s28 = scalar_select %p27_p1, %s789_s22, %s29_s26  }
   0xd   : > { %p872_p5 = por %p37_p2, %p36_p0  ;;  %p876_p6 = por %p43_p4, %p42_p3 }
   0xe   : > { %p150_p7 = scmp.eq.s32.totalorder %s854_s4, 1  ;;  %p156_p8 = scmp.eq.s32.totalorder %s596_s24, 1 }
   0xf   : > { %p632_p10 = scmp.lt.s32.totalorder %s793_s23, 2  ;;  %s188_s8 = sand.u32 1, %s789_s22  }
  0x10   : > { %p883_p11 = por %p150_p7, %p36_p0  ;;  %p887_p12 = por %p156_p8, %p42_p3 }
  0x11   : > { %s618_s9 = sshll.u32 %s793_s23, 6  ;;  %s599_s10 = sshll.u32 %s188_s8, 6 }
  0x12   : > { %s197_s13 = scalar_lea.hbm %s1082_s0, %s618_s9  ;;  %s192_s15 = scalar_lea.vmem [#allocation3], %s599_s10 }
  0x13   : > { %s198_s14 = sshll.u32 %s197_s13, 4  ;;  %s200_s16 = sshll.u32 %s192_s15, 4  ;;  %s199_s14 = int_to_ptr.hbm [resolvable:$true] %s198_s14  ;;  %s201_s16 = int_to_ptr.vmem [resolvable:$true] %s200_s16 }
  0x14   : > { %p898_p13 = pnand %p632_p10, %p872_p5  ;;  %p602_p0 = scmp.ge.s32.totalorder %s793_s23, 1 }
  0x15   : > { %p208_p1 = scmp.lt.s32.totalorder %s793_s23, 3  ;;  %s189_s18 = scalar_lea.sflag [#allocation4], %s188_s8 }
  0x16   : > { %s697_s19 = sshra.s32 %s199_s14, 4  ;;  %p701_p3 = pneg %p898_p13  ;;  %s698_s19 = int_to_ptr.hbm [resolvable:$true] %s697_s19 }
  0x17   : > { %s699_s24 = scalar_lea.hbm %s698_s19, 64  ;;  %s704_s29 = scalar_lea.hbm %s1082_s0, 128 }
  0x18   : > { %p700_p2 = scmp.ne.s32.totalorder %s698_s19, %s699_s24  ;;  %p705_p5 = scmp.lt.s32.totalorder %s698_s19, %s1082_s0 }
  0x19   : > { %p706_p8 = scmp.lt.s32.totalorder %s704_s29, %s699_s24 }
  0x1a   : > { %p702_p4 = pnand %p701_p3, %p700_p2 }
  0x1b   : > { %p707_p10 = por %p706_p8, %p705_p5 }
  0x1c   : > { %p703_p7 = pneg %p702_p4 }
  0x1e   : > { %p708_p9 = pnand %p707_p10, %p703_p7 }
  0x20   : > { %711 = shalt.err (!%p708_p9)
}
  0x21   : > { %s795_s8 = smov 256   ;;  %s796_s11 = smov 16  }
  0x22   : > { %627 = dma.hbm_to_vmem [thread:$0]  (!%p898_p13), %s199_s14, 1024, %s201_s16, %s189_s18, %s795_s8, %s795_s8, %s796_s11  }
  0x23   : > { %p209_p2 = pnand %p602_p0, %p208_p1 }
  0x24   : > { %s919_s12 = sand.u32 (!%p209_p2), 1, %s785_s21  }
  0x25   : > { %212 = sbr.rel (%p209_p2) target bundleno = 362 (0x16a), region = 40  ;;  %s603_s13 = sshll.u32 (!%p209_p2), %s919_s12, 6 }
  0x26   : > { %s215_s15 = scalar_lea.sflag (!%p209_p2), [#allocation4], %s919_s12  ;;  %s218_s19 = scalar_lea.vmem (!%p209_p2), [#allocation3], %s603_s13 }
  0x2a   : > { %772 = dma.done.wait (%p876_p6), %s215_s15, 1024  }
  0x2b   : > { %774 = vsyncadd (%p876_p6), %s215_s15, 4294966272  ;;  %v929_v0 = vld [vmem:[%s218_s19] sm:$0xff]  ;;  %v931_v1 = vld [vmem:[%s218_s19 + $0x8] sm:$0xff]  ;;  %v797_v12 = vmov 256.0   ;;  %vm399_vm0 = vcmask 261120   ;;  %vm285_vm2 = vcmask 15360  }
  0x2c   : > { %v933_v2 = vld [vmem:[%s218_s19 + $0x20] sm:$0xff]  ;;  %v254_v3 = vadd.f32 %v931_v1, %v929_v0  ;;  %v937_v4 = vld [vmem:[%s218_s19 + $0x28] sm:$0xff]  ;;  %v941_v6 = vld [vmem:[%s218_s19 + $0x30] sm:$0xff]  ;;  %671 = vrcp.f32 %v797_v12  ;;  %s397_s17 = sld [smem:[#allocation2]]  ;;  %s1027_s18 = scalar_lea.vmem [#allocation6], %s603_s13 }
  0x2d   : > { %v260_v5 = vadd.f32 %v937_v4, %v933_v2  ;;  %v943_v7 = vld [vmem:[%s218_s19 + $0x38] sm:$0xff]  ;;  %415 = vmatpush.msra.mxu0 %v941_v6  ;;  %v946_v8 = vld [vmem:[%s218_s19 + $0x10] sm:$0xff]  ;;  %v396_v14 = vld [vmem:[%s1085_s3] sm:$0x1]  ;;  %s619_s24 = sshll.u32 %s854_s4, 6  ;;  %s520_s4 = sshll.u32 %s1027_s18, 4  ;;  %s521_s4 = int_to_ptr.vmem [resolvable:$true] %s520_s4 }
  0x2e   : > { %255 = vadd.xlane.f32.xlu0 %v254_v3  ;;  %v948_v9 = vld [vmem:[%s218_s19 + $0x18] sm:$0xff]  ;;  %435 = vmatpush.msra.mxu1 %v943_v7  ;;  %v263_v11 = vadd.f32 %v943_v7, %v941_v6  ;;  %v277_v23 = vld [vmem:[%s1083_s1] sm:$0xff]  ;;  %v279_v25 = vld [vmem:[%s1083_s1 + $0x10] sm:$0xff]  ;;  %s519_s27 = scalar_lea.hbm %s1087_s5, %s619_s24  ;;  %s508_s9 = scalar_lea.sflag [#allocation5], %s919_s12 }
  0x2f   : > { %261 = vadd.xlane.f32.xlu1 %v260_v5  ;;  %416 = vmatpush.msra.mxu0 %v933_v2  ;;  %v257_v10 = vadd.f32 %v948_v9, %v946_v8  ;;  %v278_v26 = vld [vmem:[%s1083_s1 + $0x8] sm:$0xff]  ;;  %v280_v30 = vld [vmem:[%s1083_s1 + $0x18] sm:$0xff]  ;;  %v302_v50 = vld [vmem:[%s1084_s2 + $0x10] sm:$0xff]  ;;  %s522_s29 = sshll.u32 %s519_s27, 4  ;;  %s747_s19 = scalar_lea.hbm %s1087_s5, 128  ;;  %s523_s29 = int_to_ptr.hbm [resolvable:$true] %s522_s29 }
  0x30   : > { %436 = vmatpush.msra.mxu1 %v937_v4  ;;  %v303_v49 = vld [vmem:[%s1084_s2 + $0x18] sm:$0xff]  ;;  %v300_v51 = vld [vmem:[%s1084_s2] sm:$0xff]  ;;  %v301_v59 = vld [vmem:[%s1084_s2 + $0x8] sm:$0xff]  ;;  %s741_s10 = sshra.s32 %s523_s29, 4  ;;  %s742_s10 = int_to_ptr.hbm [resolvable:$true] %s741_s10 }
  0x31   : > { %417 = vmatpush.msra.mxu0 %v946_v8  ;;  %s743_s8 = scalar_lea.hbm %s742_s10, 64  ;;  %p748_p0 = scmp.lt.s32.totalorder %s742_s10, %s1087_s5 }
  0x32   : > { %437 = vmatpush.msra.mxu1 %v948_v9  ;;  %v672_v13 = vpop.eup %671  ;;  %v398_v62 = vstv %s397_s17  ;;  %p744_p6 = scmp.ne.s32.totalorder %s742_s10, %s743_s8  ;;  %p749_p1 = scmp.lt.s32.totalorder %s747_s19, %s743_s8 }
  0x33   : > { %418 = vmatpush.msra.mxu0 %v929_v0  ;;  %v267_v15 = vmul.f32 256.0, %v672_v13  ;;  %vm271_vm1 = vweird.f32 %v672_v13 }
  0x34   : > { %438 = vmatpush.msra.mxu1 %v931_v1  ;;  %609 = vmatmul.msk.f32.vlgmr.msra.gmra.mxu0 %vm399_vm0, %v396_v14  ;;  %p745_p9 = pnand %p744_p6, %p883_p11  ;;  %p750_p3 = por %p749_p1, %p748_p0 }
  0x35   : > { %610 = vmatmul.msk.f32.vlgmr.msra.gmra.mxu1 %vm399_vm0, %v396_v14  ;;  %v268_v16 = vsub.f32 1.0, %v267_v15 }
  0x36   : > { %258 = vadd.xlane.f32.xlu0 %v257_v10  ;;  %p746_p13 = pneg %p745_p9 }
  0x37   : > { %264 = vadd.xlane.f32.xlu1 %v263_v11  ;;  %v269_v17 = vmul.f32 %v672_v13, %v268_v16 }
  0x38   : > { %p751_p4 = pnand %p750_p3, %p746_p13 }
  0x39   : > { %v270_v18 = vadd.f32 %v672_v13, %v269_v17 }
  0x3b   : > { %v272_v21 = vsel %vm271_vm1, %v672_v13, %v270_v18 }
  0xa1   : > { %v256_v19 = vpop.xlane.xlu0 %255 }
  0xa2   : > { %v262_v20 = vpop.xlane.xlu1 %261  ;;  %v273_v22 = vmul.f32 %v272_v21, %v256_v19 }
  0xa3   : > { %v275_v24 = vmul.f32 %v272_v21, %v262_v20 }
  0xa4   : > { %v281_v28 = vmul.f32 %v277_v23, %v273_v22 }
  0xa5   : > { %v283_v33 = vmul.f32 %v279_v25, %v275_v24 }
  0xa6   : > { %v286_v36 = vsel %vm285_vm2, %v281_v28, 0.0 }
  0xa7   : > { %v289_v39 = vsel %vm285_vm2, %v283_v33, 0.0 }
  0xa9   : > { %v259_v27 = vpop.xlane.xlu0 %258 }
  0xaa   : > { %v274_v29 = vmul.f32 %v272_v21, %v259_v27  ;;  %v265_v31 = vpop.xlane.xlu1 %264 }
  0xab   : > { %v276_v32 = vmul.f32 %v272_v21, %v265_v31 }
  0xac   : > { %v282_v34 = vmul.f32 %v278_v26, %v274_v29 }
  0xad   : > { %v284_v35 = vmul.f32 %v280_v30, %v276_v32 }
  0xae   : > { %v287_v37 = vsel %vm285_vm2, %v282_v34, 0.0 }
  0xaf   : > { %v288_v38 = vadd.f32 %v287_v37, %v286_v36  ;;  %v291_v40 = vsel %vm285_vm2, %v284_v35, 0.0 }
  0xb1   : > { %v290_v41 = vadd.f32 %v289_v39, %v288_v38  ;;  %v420_v63 = vpop.f32.mrf.mxu0 }
  0xb2   : > { %v440_v3 = vpop.f32.mrf.mxu1  ;;  %v421_v5 = vadd.f32 %v420_v63, %v398_v62 }
  0xb3   : > { %v292_v42 = vadd.f32 %v291_v40, %v290_v41  ;;  %v441_v10 = vadd.f32 %v440_v3, %v398_v62 }
  0xb4   : > { %v611_v11 = vmul.f32 -1.442695, %v421_v5 }
  0xb5   : > { %v293_v43 = vrot.slane %v292_v42, 4  ;;  %v612_v12 = vmul.f32 -1.442695, %v441_v10 }
  0xb6   : > { %673 = vpow2.f32 %v611_v11 }
  0xb7   : > { %v294_v44 = vadd.f32 %v293_v43, %v292_v42  ;;  %675 = vpow2.f32 %v612_v12 }
  0xb9   : > { %v295_v45 = vrot.slane %v294_v44, 2 }
  0xbb   : > { %v296_v46 = vadd.f32 %v295_v45, %v294_v44 }
  0xbc   : > { %v674_v13 = vpop.eup %673 }
  0xbd   : > { %v297_v47 = vrot.slane %v296_v46, 1  ;;  %v676_v14 = vpop.eup %675  ;;  %v449_v15 = vadd.f32 1.0, %v674_v13 }
  0xbe   : > { %v450_v16 = vadd.f32 1.0, %v676_v14 }
  0xbf   : > { %v298_v48 = vadd.f32 %v297_v47, %v296_v46  ;;  %677 = vrcp.f32 %v449_v15  ;;  %vm456_vm3 = vweird.f32 %v449_v15  ;;  %v462_v32 = vand.u32 2147483648, %v449_v15 }
  0xc0   : > { %679 = vrcp.f32 %v450_v16  ;;  %vm471_vm5 = vweird.f32 %v450_v16  ;;  %v460_v39 = vand.u32 2147483647, %v449_v15  ;;  %v477_v40 = vand.u32 2147483648, %v450_v16 }
  0xc1   : > { %v299_v52 = vmax.f32 %v298_v48, 0.0  ;;  %v475_v44 = vand.u32 2147483647, %v450_v16  ;;  %v463_v45 = vor.u32 1.1754944e-38, %v462_v32 }
  0xc2   : > { %vm461_vm9 = vcmp.eq.f32.partialorder %v460_v39, 8.507059e+37  ;;  %v478_v48 = vor.u32 1.1754944e-38, %v477_v40 }
  0xc3   : > { %v307_v53 = vmul.f32 %v303_v49, %v299_v52  ;;  %v306_v54 = vmul.f32 %v302_v50, %v299_v52  ;;  %v304_v55 = vmul.f32 %v300_v51, %v299_v52  ;;  %v305_v60 = vmul.f32 %v301_v59, %v299_v52 }
  0xc4   : > { %vm476_vm10 = vcmp.eq.f32.partialorder %v475_v44, 8.507059e+37 }
  0xc5   : > { %v317_v56 = vsel %vm285_vm2, %v307_v53, 0.0  ;;  %v314_v57 = vsel %vm285_vm2, %v306_v54, 0.0  ;;  %v308_v58 = vsel %vm285_vm2, %v304_v55, 0.0  ;;  %v311_v61 = vsel %vm285_vm2, %v305_v60, 0.0  ;;  %v678_v17 = vpop.eup %677 }
  0xc6   : > { %318 = vadd.xlane.f32.xlu1 %v317_v56  ;;  %315 = vadd.xlane.f32.xlu0 %v314_v57  ;;  %v680_v18 = vpop.eup %679  ;;  %v452_v19 = vmul.f32 %v678_v17, %v449_v15  ;;  %vm457_vm4 = vweird.f32 %v678_v17 }
  0xc7   : > { %309 = vadd.xlane.f32.xlu2 %v308_v58  ;;  %v467_v20 = vmul.f32 %v680_v18, %v450_v16  ;;  %vm472_vm6 = vweird.f32 %v680_v18  ;;  %vm996_vm7 = vmor %vm456_vm3, %vm457_vm4 }
  0xc8   : > { %v453_v27 = vsub.f32 1.0, %v452_v19  ;;  %vm473_vm8 = vmor %vm471_vm5, %vm472_vm6 }
  0xc9   : > { %v468_v28 = vsub.f32 1.0, %v467_v20 }
  0xca   : > { %v454_v29 = vmul.f32 %v678_v17, %v453_v27 }
  0xcb   : > { %v469_v30 = vmul.f32 %v680_v18, %v468_v28 }
  0xcc   : > { %v455_v38 = vadd.f32 %v678_v17, %v454_v29 }
  0xcd   : > { %v470_v43 = vadd.f32 %v680_v18, %v469_v30 }
  0xce   : > { %v459_v47 = vsel %vm996_vm7, %v678_v17, %v455_v38 }
  0xcf   : > { %312 = vadd.xlane.f32.xlu2 %v311_v61  ;;  %v474_v49 = vsel %vm473_vm8, %v680_v18, %v470_v43  ;;  %v464_v51 = vsel %vm461_vm9, %v463_v45, %v459_v47 }
  0xd0   : > { %v479_v53 = vsel %vm476_vm10, %v478_v48, %v474_v49  ;;  %v1005_v57 = vperm.slane %v464_v51, 0 }
  0xd1   : > { %v1009_v62 = vperm.slane %v479_v53, 0 }
 0x139   : > { %v319_v21 = vpop.xlane.xlu1 %318  ;;  %v316_v22 = vpop.xlane.xlu0 %315 }
 0x13a   : > { %v608_v23 = vmul.f32 -1.442695, %v319_v21  ;;  %v607_v24 = vmul.f32 -1.442695, %v316_v22  ;;  %v310_v25 = vpop.xlane.xlu2 %309 }
 0x13b   : > { %v605_v26 = vmul.f32 -1.442695, %v310_v25 }
 0x13c   : > { %681 = vpow2.f32 %v608_v23 }
 0x13d   : > { %683 = vpow2.f32 %v607_v24 }
 0x13e   : > { %685 = vpow2.f32 %v605_v26 }
 0x142   : > { %v682_v31 = vpop.eup %681  ;;  %v313_v33 = vpop.xlane.xlu2 %312 }
 0x143   : > { %v684_v34 = vpop.eup %683  ;;  %v335_v35 = vadd.f32 1.0, %v682_v31  ;;  %v606_v36 = vmul.f32 -1.442695, %v313_v33 }
 0x144   : > { %v686_v37 = vpop.eup %685  ;;  %v334_v41 = vadd.f32 1.0, %v684_v34 }
 0x145   : > { %687 = vrcp.f32 %v335_v35  ;;  %v1000_v46 = vadd.f32 1.0, %v686_v37  ;;  %v390_v59 = vand.u32 2147483647, %v335_v35  ;;  %v392_v63 = vand.u32 2147483648, %v335_v35 }
 0x146   : > { %689 = vrcp.f32 %v334_v41  ;;  %v377_v5 = vand.u32 2147483648, %v334_v41  ;;  %vm386_vm12 = vweird.f32 %v335_v35  ;;  %v375_v13 = vand.u32 2147483647, %v334_v41 }
 0x147   : > { %691 = vpow2.f32 %v606_v36  ;;  %vm391_vm14 = vcmp.eq.f32.partialorder %v390_v59, 8.507059e+37  ;;  %vm371_vm15 = vweird.f32 %v334_v41  ;;  %v393_v16 = vor.u32 1.1754944e-38, %v392_v63 }
 0x148   : > { %693 = vrcp.f32 %v1000_v46  ;;  %v378_v18 = vor.u32 1.1754944e-38, %v377_v5  ;;  %v347_v19 = vand.u32 2147483648, %v1000_v46  ;;  %v345_v22 = vand.u32 2147483647, %v1000_v46 }
 0x149   : > { %vm376_vm3 = vcmp.eq.f32.partialorder %v375_v13, 8.507059e+37  ;;  %vm341_vm4 = vweird.f32 %v1000_v46 }
 0x14a   : > { %v348_v32 = vor.u32 1.1754944e-38, %v347_v19  ;;  %vm346_vm6 = vcmp.eq.f32.partialorder %v345_v22, 8.507059e+37 }
 0x14b   : > { %v688_v50 = vpop.eup %687 }
 0x14c   : > { %v690_v52 = vpop.eup %689  ;;  %v382_v54 = vmul.f32 %v688_v50, %v335_v35  ;;  %vm387_vm11 = vweird.f32 %v688_v50 }
 0x14d   : > { %v692_v55 = vpop.eup %691  ;;  %v367_v56 = vmul.f32 %v690_v52, %v334_v41  ;;  %vm372_vm13 = vweird.f32 %v690_v52  ;;  %vm388_vm0 = vmor %vm386_vm12, %vm387_vm11 }
 0x14e   : > { %v383_v58 = vsub.f32 1.0, %v382_v54  ;;  %v1007_v60 = vadd.f32 1.0, %v692_v55  ;;  %v694_v61 = vpop.eup %693  ;;  %vm373_vm1 = vmor %vm371_vm15, %vm372_vm13 }
 0x14f   : > { %v368_v3 = vsub.f32 1.0, %v367_v56  ;;  %v337_v11 = vmul.f32 %v694_v61, %v1000_v46  ;;  %vm342_vm2 = vweird.f32 %v694_v61 }
 0x150   : > { %v384_v10 = vmul.f32 %v688_v50, %v383_v58  ;;  %695 = vrcp.f32 %v1007_v60  ;;  %vm343_vm5 = vmor %vm341_vm4, %vm342_vm2  ;;  %v362_v41 = vand.u32 2147483648, %v1007_v60  ;;  %vm356_vm8 = vweird.f32 %v1007_v60 }
 0x151   : > { %v369_v12 = vmul.f32 %v690_v52, %v368_v3  ;;  %v338_v15 = vsub.f32 1.0, %v337_v11 }
 0x152   : > { %v385_v14 = vadd.f32 %v688_v50, %v384_v10  ;;  %v363_v45 = vor.u32 1.1754944e-38, %v362_v41 }
 0x153   : > { %v370_v17 = vadd.f32 %v690_v52, %v369_v12  ;;  %v339_v21 = vmul.f32 %v694_v61, %v338_v15 }
 0x154   : > { %v389_v20 = vsel %vm388_vm0, %v688_v50, %v385_v14 }
 0x155   : > { %v394_v23 = vsel %vm391_vm14, %v393_v16, %v389_v20  ;;  %v374_v24 = vsel %vm373_vm1, %v690_v52, %v370_v17  ;;  %v340_v29 = vadd.f32 %v694_v61, %v339_v21 }
 0x156   : > { %v696_v25 = vpop.eup %695  ;;  %v489_v26 = vadd.f32 %v1005_v57, %v394_v23  ;;  %v490_v27 = vadd.f32 %v1009_v62, %v394_v23  ;;  %v379_v28 = vsel %vm376_vm3, %v378_v18, %v374_v24 }
 0x157   : > { %v487_v30 = vadd.f32 %v1005_v57, %v379_v28  ;;  %v488_v31 = vadd.f32 %v1009_v62, %v379_v28  ;;  %v352_v33 = vmul.f32 %v696_v25, %v1007_v60  ;;  %v344_v36 = vsel %vm343_vm5, %v694_v61, %v340_v29 }
 0x158   : > { %v497_v34 = vmul.f32 %v489_v26, %v941_v6  ;;  %v498_v35 = vmul.f32 %v490_v27, %v943_v7  ;;  %v349_v39 = vsel %vm346_vm6, %v348_v32, %v344_v36  ;;  %vm357_vm7 = vweird.f32 %v696_v25 }
 0x159   : > { %v495_v37 = vmul.f32 %v487_v30, %v933_v2  ;;  %v496_v38 = vmul.f32 %v488_v31, %v937_v4  ;;  %v353_v40 = vsub.f32 1.0, %v352_v33  ;;  %v483_v6 = vadd.f32 %v1005_v57, %v349_v39  ;;  %vm358_vm9 = vmor %vm356_vm8, %vm357_vm7 }
 0x15a   : > { %505 = vst [vmem:[%s1027_s18 + $0x30] sm:$0xff] %v497_v34  ;;  %v484_v7 = vadd.f32 %v1009_v62, %v349_v39  ;;  %v360_v4 = vand.u32 2147483647, %v1007_v60 }
 0x15b   : > { %506 = vst [vmem:[%s1027_s18 + $0x38] sm:$0xff] %v498_v35  ;;  %v354_v2 = vmul.f32 %v696_v25, %v353_v40  ;;  %v491_v42 = vmul.f32 %v483_v6, %v929_v0 }
 0x15c   : > { %503 = vst [vmem:[%s1027_s18 + $0x20] sm:$0xff] %v495_v37  ;;  %v492_v43 = vmul.f32 %v484_v7, %v931_v1  ;;  %vm361_vm10 = vcmp.eq.f32.partialorder %v360_v4, 8.507059e+37 }
 0x15d   : > { %504 = vst [vmem:[%s1027_s18 + $0x28] sm:$0xff] %v496_v38  ;;  %v355_v44 = vadd.f32 %v696_v25, %v354_v2 }
 0x15e   : > { %499 = vst [vmem:[%s1027_s18] sm:$0xff] %v491_v42 }
 0x15f   : > { %500 = vst [vmem:[%s1027_s18 + $0x8] sm:$0xff] %v492_v43  ;;  %v359_v46 = vsel %vm358_vm9, %v696_v25, %v355_v44 }
 0x160   : > { %v364_v0 = vsel %vm361_vm10, %v363_v45, %v359_v46 }
 0x161   : > { %v485_v1 = vadd.f32 %v1005_v57, %v364_v0  ;;  %v486_v47 = vadd.f32 %v1009_v62, %v364_v0 }
 0x163   : > { %v493_v48 = vmul.f32 %v485_v1, %v946_v8  ;;  %v494_v49 = vmul.f32 %v486_v47, %v948_v9 }
 0x165   : > { %501 = vst [vmem:[%s1027_s18 + $0x10] sm:$0xff] %v493_v48 }
 0x166   : > { %502 = vst [vmem:[%s1027_s18 + $0x18] sm:$0xff] %v494_v49 }
 0x167   : > { %754 = shalt.err (!%p751_p4)
}
 0x168   : > { %s798_s12 = smov 256   ;;  %s799_s16 = smov 16  }
 0x169   : > { %622 = dma.vmem_to_hbm [thread:$0]  (%p883_p11), %s521_s4, 1024, %s523_s29, %s508_s9, %s798_s12, %s798_s12, %s799_s16  }
 0x16a PF: > { %s537_s17 = sand.u32 1, %s781_s20   ;;  %p1095_p7 = scmp.ge.s32.totalorder %s793_s23, 2 }
 0x16b   : > { %s538_s18 = scalar_lea.sflag [#allocation5], %s537_s17 }
 0x16c   : > { %p629_p5 = pnand %p1095_p7, %p887_p12 }
 0x16e   : > { %p630_p8 = pneg %p629_p5 }
 0x170   : > { %776 = dma.done.wait (%p630_p8), %s538_s18, 1024  }
 0x171   : > { %778 = vsyncadd (%p630_p8), %s538_s18, 4294966272  ;;  %p19_p10 = scmp.ge.s32.totalorder %s858_s25, 4   ;;  %s1096_s20 = smov %s785_s21 }
 0x172   : > { %s1097_s21 = smov %s789_s22  ;;  %s1098_s22 = smov %s870_s28 }
 0x173   : > { %s1099_s23 = smov %s858_s25  ;;  %21 = sbr.rel (!%p19_p10) target bundleno = 7 (0x7), region = 85 }
 0x178   :  { %544 = vsyncpa [#allocation4], 1 }
 0x179   :  { %546 = vsyncpa [#allocation4 + $0x1], 1 }
 0x17a   :  { %547 = vsyncpa [#allocation5], 1 }
 0x17b   :  { %549 = vsyncpa [#allocation5 + $0x1], 1 }

</bundles_post_ra>
